<compile_context>
chip_gen: v5e
topology: v5e:2x2
jax: 0.10.0
libtpu: 0.0.40
codegen_flags: <defaults>
</compile_context>

<pallas_src>
import jax
import jax.numpy as jnp
from jax.experimental import pallas as pl
from jax.experimental.pallas import tpu as pltpu

EPS = 1e-5


def _round_up(x, m):
    return (x + m - 1) // m * m


def _vmem_capacity():
    try:
        return int(pltpu.get_tpu_info().vmem_capacity_bytes)
    except Exception:
        return 64 * 1024 * 1024            # conservative (v7x-sized) fallback


def _pick_stats_tile(hw):
    """Lane-dense spatial tile for pass 1: a multiple of 128 dividing H*W, else full."""
    for ts in (4096, 2048, 1024, 512, 256, 128):
        if hw % ts == 0:
            return ts
    return hw


def _pick_tile_rows(H, W, cin, cout, budget_bytes, max_unroll=64):
    """Input-image rows per pass-2 grid step.

    Legal th: th | H and (th % 8 == 0 and (th*4*W) % 128 == 0) or th == H.
    Pick the largest legal th <= max_unroll that fits the VMEM budget."""
    legal = [th for th in range(1, H + 1)
             if H % th == 0 and (th == H or (th % 8 == 0 and (th * 4 * W) % 128 == 0))]
    per_row = 8 * W * (cin + 4 * cout)     # double-buffered x + out bytes per input row (f32)
    best = None
    for th in legal:
        if th <= max_unroll and th * per_row <= budget_bytes:
            best = th
    return best if best is not None else legal[0]


def _stats_kernel(x_ref, g_ref, sx_ref):
    """Pass 1: per-image X moments.  G += X X^T, SX += row-sum(X).

    x_ref: (1, Cin, TS);  g_ref: (1, Cin, Cin);  sx_ref: (1, Cin, 1)."""
    @pl.when(pl.program_id(1) == 0)
    def _init():
        g_ref[...] = jnp.zeros_like(g_ref)
        sx_ref[...] = jnp.zeros_like(sx_ref)

    x = x_ref[0]                                                     # (Cin, TS)
    g_ref[0] += jax.lax.dot_general(                                 # X @ X^T  (contract lanes)
        x, x, (((1,), (1,)), ((), ())), preferred_element_type=jnp.float32)
    sx_ref[0] += jnp.sum(x, axis=1, keepdims=True)


def _make_apply_kernel(cp, cout, th, W):
    def _apply_kernel(x_ref, w_ref, shift_ref, s0_ref, s1_ref, o_ref):
        """Pass 2: out = (scale*W) @ x + shift with the 2x2 sub-pixel interleave fused
        into a lane-flat output block (flat index = r*4W + kh*2W + 2c + kw).

        x_ref:     (1, Cin, th, W)
        w_ref:     (4*cp, Cin)   rows ordered (kw, kh, cout); BN scale pre-folded
        shift_ref: (4*cp, 1)
        s0/s1_ref: (W, 2W)       column-spread matrices: c -> 2c  /  c -> 2c+1
        o_ref:     (1, Cout, th*4*W)
        """
        wmat = w_ref[...]
        shift = shift_ref[...]
        s0 = s0_ref[...]
        s1 = s1_ref[...]
        for r in range(th):                       # static unroll; th kept small by chooser
            xr = x_ref[0, :, r, :]                                    # (Cin, W)
            yr = jnp.dot(wmat, xr, preferred_element_type=jnp.float32) + shift  # (4cp, W)
            # kw lane-interleave via MXU spread matmuls (MXU has slack; VPU/XLU stay free)
            ev = jnp.dot(yr[0:2 * cp], s0, preferred_element_type=jnp.float32)   # kw=0 -> even
            od = jnp.dot(yr[2 * cp:4 * cp], s1, preferred_element_type=jnp.float32)  # kw=1 -> odd
            z = ev + od                                               # (2cp, 2W), rows (kh, cout)
            base = r * 4 * W
            o_ref[0, :, base:base + 2 * W] = z[0:cout]                # output row 2r
            o_ref[0, :, base + 2 * W:base + 4 * W] = z[cp:cp + cout]  # output row 2r+1
    return _apply_kernel


def unet_deconv_block(x, weight, bias, gamma, beta, *, tile_rows=None):
    """x: (N, Cin, H, W); weight: (Cin, Cout, 2, 2) (PyTorch ConvTranspose2d layout)."""
    N, Cin, H, W = map(int, x.shape)
    Cout = int(weight.shape[1])
    HW = H * W
    Cp = _round_up(Cout, 8)                  # per-(kh,kw)-group pad: sublane dim only needs 8

    cap = _vmem_capacity()
    vmem_limit = int(min(cap * 3 // 4, 96 * 1024 * 1024))
    budget = vmem_limit // 3

    if tile_rows is None:
        th = _pick_tile_rows(H, W, Cin, Cout, budget)
    else:
        th = int(tile_rows)
        assert H % th == 0 and (th == H or (th % 8 == 0 and (th * 4 * W) % 128 == 0))
    num_t = H // th

    x = x.astype(jnp.float32)
    # (Cin, Cout, kh, kw) -> (kw, kh, Cout, Cin): group index g = 2*kw + kh
    wr = jnp.transpose(weight, (3, 2, 1, 0)).reshape(4, Cout, Cin).astype(jnp.float32)

    # ---- pass 1: X-moment statistics (only x is streamed; y is never materialized) --
    ts1 = _pick_stats_tile(HW)
    x3 = x.reshape(N, Cin, HW)                               # free reshape
    g_all, sx_all = pl.pallas_call(
        _stats_kernel,
        out_shape=(jax.ShapeDtypeStruct((N, Cin, Cin), jnp.float32),
                   jax.ShapeDtypeStruct((N, Cin, 1), jnp.float32)),
        grid_spec=pltpu.PrefetchScalarGridSpec(
            num_scalar_prefetch=0,
            grid=(N, HW // ts1),
            in_specs=[pl.BlockSpec((1, Cin, ts1), lambda n, t: (n, 0, t))],
            out_specs=(pl.BlockSpec((1, Cin, Cin), lambda n, t: (n, 0, 0)),
                       pl.BlockSpec((1, Cin, 1), lambda n, t: (n, 0, 0)))),
        compiler_params=pltpu.CompilerParams(
            dimension_semantics=("parallel", "arbitrary"),
            vmem_limit_bytes=vmem_limit),
    )(x3)

    # ---- tiny host-side BN math: mean/var from W, G, SX ------------------------------
    count = jnp.float32(4 * N * HW)                          # N * 2H * 2W samples / channel
    G = jnp.sum(g_all, axis=0)                               # (Cin, Cin)
    SX = jnp.sum(sx_all, axis=0)[:, 0]                       # (Cin,)
    sum_y = jnp.einsum('gok,k->o', wr, SX)
    sum_y2 = jnp.einsum('gok,kl,gol->o', wr, G, wr)
    mean_y = sum_y / count
    # TODO(synk): E[y^2]-E[y]^2 in f32 can cancel for large non-centered activations;
    # a centered second pass would be more robust.  Clamped to stay non-negative.
    var = jnp.maximum(sum_y2 / count - mean_y * mean_y, 0.0)
    scale = gamma.astype(jnp.float32) * jax.lax.rsqrt(var + EPS)
    shift = beta.astype(jnp.float32) - mean_y * scale
    _ = bias   # ConvTranspose2d bias cancels exactly under training-mode BatchNorm

    # Fold BN scale into the tiny resident packed weight; pad each group to Cp rows.
    wsc = wr * scale[None, :, None]                                            # (4, Cout, Cin)
    wp = jnp.zeros((4, Cp, Cin), jnp.float32).at[:, :Cout, :].set(wsc).reshape(4 * Cp, Cin)
    shiftp = jnp.zeros((4, Cp, 1), jnp.float32).at[:, :Cout, 0].set(shift).reshape(4 * Cp, 1)

    # Column-spread (interleave) matrices: c -> 2c (kw=0) and c -> 2c+1 (kw=1).
    col = jnp.arange(2 * W)[None, :]
    row = jnp.arange(W)[:, None]
    s0 = (col == 2 * row).astype(jnp.float32)
    s1 = (col == 2 * row + 1).astype(jnp.float32)

    # ---- pass 2: deconv + BN, sub-pixel interleave fused into the store --------------
    out_flat = pl.pallas_call(
        _make_apply_kernel(Cp, Cout, th, W),
        out_shape=jax.ShapeDtypeStruct((N, Cout, 4 * HW), jnp.float32),
        grid_spec=pltpu.PrefetchScalarGridSpec(
            num_scalar_prefetch=0,
            grid=(N, num_t),
            in_specs=[pl.BlockSpec((1, Cin, th, W), lambda n, t: (n, 0, t, 0)),
                      pl.BlockSpec((4 * Cp, Cin), lambda n, t: (0, 0)),
                      pl.BlockSpec((4 * Cp, 1), lambda n, t: (0, 0)),
                      pl.BlockSpec((W, 2 * W), lambda n, t: (0, 0)),
                      pl.BlockSpec((W, 2 * W), lambda n, t: (0, 0))],
            out_specs=pl.BlockSpec((1, Cout, th * 4 * W), lambda n, t: (n, 0, t))),
        compiler_params=pltpu.CompilerParams(
            dimension_semantics=("parallel", "parallel"),
            vmem_limit_bytes=vmem_limit),
    )(x, wp, shiftp, s0, s1)

    # Free reshape: flat index r*4W + kh*2W + 2c + kw  ==  row (2r+kh), col (2c+kw).
    return out_flat.reshape(N, Cout, 2 * H, 2 * W)


def _reference(x, weight, bias, gamma, beta):
    """Pure-JAX reference: ConvTranspose2d(k=2, s=2) + BatchNorm2d (training stats)."""
    N, Cin, H, W = x.shape
    Cout = weight.shape[1]
    y = jnp.einsum('nchw,cokl->nohkwl', x, weight)            # (N, Cout, H, kh, W, kw)
    y = y.reshape(N, Cout, 2 * H, 2 * W) + bias[None, :, None, None]
    mean = y.mean(axis=(0, 2, 3), keepdims=True)
    var = ((y - mean) ** 2).mean(axis=(0, 2, 3), keepdims=True)
    return (y - mean) / jnp.sqrt(var + EPS) * gamma[None, :, None, None] \
        + beta[None, :, None, None]


if __name__ == "__main__":
    # Module config: dim1 (in channels) = 4, dim2 (out channels) = 8
    dim1, dim2 = 4, 8
    N, H, W = 2, 16, 16

    key = jax.random.PRNGKey(0)
    kx, kw, kb, kg, kbe = jax.random.split(key, 5)

    x = jax.random.normal(kx, (N, dim1, H, W), dtype=jnp.float32)
    weight = 0.1 * jax.random.normal(kw, (dim1, dim2, 2, 2), dtype=jnp.float32)
    bias = 0.1 * jax.random.normal(kb, (dim2,), dtype=jnp.float32)
    gamma = 1.0 + 0.1 * jax.random.normal(kg, (dim2,), dtype=jnp.float32)
    beta = 0.1 * jax.random.normal(kbe, (dim2,), dtype=jnp.float32)

    # tile_rows=8 forces a 2-step spatial grid per image (H=16), exercising the
    # pass-1 accumulator init and both index maps even at this small test size.
    out = unet_deconv_block(x, weight, bias, gamma, beta, tile_rows=8)
    out = jax.block_until_ready(out)

    ref = _reference(x, weight, bias, gamma, beta)
    assert out.shape == (N, dim2, 2 * H, 2 * W)
    err = float(jnp.max(jnp.abs(out - ref)))
    assert jnp.allclose(out, ref, atol=1e-4, rtol=1e-4), err

    print("KERNEL_OK")
</pallas_src>

<mosaic_0001>
module attributes {stable_mosaic.version = 11 : i64} {
  func.func @_stats_kernel(%arg0: i32, %arg1: i32, %arg2: memref<1x4x256xf32, #tpu.memory_space<vmem>>, %arg3: memref<1x4x4xf32, #tpu.memory_space<vmem>>, %arg4: memref<1x4x1xf32, #tpu.memory_space<vmem>>) attributes {dimension_semantics = [#tpu.dimension_semantics<parallel>, #tpu.dimension_semantics<arbitrary>], iteration_bounds = array<i64: 2, 1>, scalar_prefetch = 0 : i64, scratch_operands = 0 : i64, tpu.core_type = #tpu.core_type<tc>, window_params = [{transform_indices = @transform_0, window_bounds = array<i64: 1, 4, 256>}, {transform_indices = @transform_1, window_bounds = array<i64: 1, 4, 4>}, {transform_indices = @transform_2, window_bounds = array<i64: 1, 4, 1>}]} {
    %c0_i32 = arith.constant 0 : i32
    %0 = arith.cmpi eq, %arg1, %c0_i32 : i32
    %1 = arith.extui %0 : i1 to i32
    %c0_i32_0 = arith.constant 0 : i32
    %2 = arith.cmpi ne, %1, %c0_i32_0 : i32
    scf.if %2 {
      %cst_16 = arith.constant 0.000000e+00 : f32
      %20 = vector.broadcast %cst_16 : f32 to vector<1x4x4xf32>
      %c0_17 = arith.constant 0 : index
      %c0_18 = arith.constant 0 : index
      %c0_19 = arith.constant 0 : index
      %21 = vector.load %arg3[%c0_17, %c0_18, %c0_19] : memref<1x4x4xf32, #tpu.memory_space<vmem>>, vector<1x4x4xf32>
      tpu.vector_store %arg3[%c0_17, %c0_18, %c0_19], %20 {strides = array<i32>} : memref<1x4x4xf32, #tpu.memory_space<vmem>>, vector<1x4x4xf32>,
      %cst_20 = arith.constant 0.000000e+00 : f32
      %22 = vector.broadcast %cst_20 : f32 to vector<1x4x1xf32>
      %c0_21 = arith.constant 0 : index
      %c0_22 = arith.constant 0 : index
      %c0_23 = arith.constant 0 : index
      %23 = vector.load %arg4[%c0_21, %c0_22, %c0_23] : memref<1x4x1xf32, #tpu.memory_space<vmem>>, vector<1x4x1xf32>
      tpu.vector_store %arg4[%c0_21, %c0_22, %c0_23], %22 {strides = array<i32>} : memref<1x4x1xf32, #tpu.memory_space<vmem>>, vector<1x4x1xf32>,
    } else {
    }
    %c0 = arith.constant 0 : index
    %c0_1 = arith.constant 0 : index
    %c0_2 = arith.constant 0 : index
    %3 = vector.load %arg2[%c0, %c0_1, %c0_2] : memref<1x4x256xf32, #tpu.memory_space<vmem>>, vector<1x4x256xf32>
    %4 = vector.shape_cast %3 : vector<1x4x256xf32> to vector<4x256xf32>
    %c0_3 = arith.constant 0 : index
    %c0_4 = arith.constant 0 : index
    %c0_5 = arith.constant 0 : index
    %5 = vector.load %arg3[%c0_3, %c0_4, %c0_5] : memref<1x4x4xf32, #tpu.memory_space<vmem>>, vector<1x4x4xf32>
    %6 = vector.shape_cast %5 : vector<1x4x4xf32> to vector<4x4xf32>
    %cst = arith.constant dense<0.000000e+00> : vector<4x4xf32>
    %7 = tpu.matmul %4, %4, %cst {dimension_numbers = #tpu.dot_dimension_numbers<[1], [1], [0], [0], [0, 0, 1, 0], [], []>} : vector<4x256xf32>, vector<4x256xf32>, vector<4x4xf32> -> vector<4x4xf32>
    %8 = arith.addf %6, %7 : vector<4x4xf32>
    %c0_6 = arith.constant 0 : index
    %c0_7 = arith.constant 0 : index
    %c0_8 = arith.constant 0 : index
    %9 = vector.load %arg3[%c0_6, %c0_7, %c0_8] : memref<1x4x4xf32, #tpu.memory_space<vmem>>, vector<1x4x4xf32>
    %10 = vector.shape_cast %9 : vector<1x4x4xf32> to vector<4x4xf32>
    %11 = vector.shape_cast %8 : vector<4x4xf32> to vector<1x4x4xf32>
    tpu.vector_store %arg3[%c0_6, %c0_7, %c0_8], %11 {strides = array<i32>} : memref<1x4x4xf32, #tpu.memory_space<vmem>>, vector<1x4x4xf32>,
    %c0_9 = arith.constant 0 : index
    %c0_10 = arith.constant 0 : index
    %c0_11 = arith.constant 0 : index
    %12 = vector.load %arg4[%c0_9, %c0_10, %c0_11] : memref<1x4x1xf32, #tpu.memory_space<vmem>>, vector<1x4x1xf32>
    %13 = vector.shape_cast %12 : vector<1x4x1xf32> to vector<4x1xf32>
    %cst_12 = arith.constant dense<0.000000e+00> : vector<4xf32>
    %14 = vector.multi_reduction <add>, %4, %cst_12 [1] : vector<4x256xf32> to vector<4xf32>
    %15 = vector.shape_cast %14 : vector<4xf32> to vector<4x1xf32>
    %16 = arith.addf %13, %15 : vector<4x1xf32>
    %c0_13 = arith.constant 0 : index
    %c0_14 = arith.constant 0 : index
    %c0_15 = arith.constant 0 : index
    %17 = vector.load %arg4[%c0_13, %c0_14, %c0_15] : memref<1x4x1xf32, #tpu.memory_space<vmem>>, vector<1x4x1xf32>
    %18 = vector.shape_cast %17 : vector<1x4x1xf32> to vector<4x1xf32>
    %19 = vector.shape_cast %16 : vector<4x1xf32> to vector<1x4x1xf32>
    tpu.vector_store %arg4[%c0_13, %c0_14, %c0_15], %19 {strides = array<i32>} : memref<1x4x1xf32, #tpu.memory_space<vmem>>, vector<1x4x1xf32>,
    return
  }
  func.func @transform_0(%arg0: i32, %arg1: i32) -> (i32, i32, i32) {
    %c0_i32 = arith.constant 0 : i32
    %c0_i32_0 = arith.constant 0 : i32
    return %arg0, %c0_i32, %arg1 : i32, i32, i32
  }
  func.func @transform_1(%arg0: i32, %arg1: i32) -> (i32, i32, i32) {
    %c0_i32 = arith.constant 0 : i32
    %c0_i32_0 = arith.constant 0 : i32
    %c0_i32_1 = arith.constant 0 : i32
    return %arg0, %c0_i32, %c0_i32_0 : i32, i32, i32
  }
  func.func @transform_2(%arg0: i32, %arg1: i32) -> (i32, i32, i32) {
    %c0_i32 = arith.constant 0 : i32
    %c0_i32_0 = arith.constant 0 : i32
    %c0_i32_1 = arith.constant 0 : i32
    return %arg0, %c0_i32, %c0_i32_0 : i32, i32, i32
  }
}

</mosaic_0001>

<bundles_post_ra>
// kernel: tpu_custom_call.1
= control target key start
LH: loop header
LB: loop body
LE: loop exit
PB: predicated region body
PF: predicated region fallthrough
CT: control target
= control target key end

     0   :  { %8 = vsyncpa [#allocation3], 0  ;;  %s734_s0 = inlined_call_operand.hbm [shape: f32[2,4,256], index: 0, kind: input, shape index: {}]   ;;  %s735_s1 = inlined_call_operand.hbm [shape: f32[2,4,4], index: 1, kind: output, shape index: {0}]   ;;  %s736_s2 = inlined_call_operand.vmem [shape: f32[2,4,1], index: 2, kind: output, shape index: {1}]  }
   0x1   :  { %10 = vsyncpa [#allocation3 + $0x1], 0 }
   0x2   :  { %11 = vsyncpa [#allocation4], 0 }
   0x3   :  { %13 = vsyncpa [#allocation4 + $0x1], 0  ;;  %s606_s9 = smov 0   ;;  %s608_s10 = smov 0  }
   0x4   :  { %s610_s11 = smov 0   ;;  %s612_s12 = smov 0  }
   0x5   :  { %s614_s13 = smov 0   ;;  %s616_s14 = smov 0  }
   0x6 LB: > { %s397_s15 = sadd.s32 4294967295, %s588_s14   ;;  %s398_s16 = sadd.s32 4294967294, %s588_s14   ;;  %s588_s14 = sphi %s616_s14, %s19_s14   ;;  %s584_s13 = sphi %s614_s13, %s745_s13   ;;  %s580_s12 = sphi %s612_s12, %s744_s12   ;;  %s576_s11 = sphi %s610_s11, %s743_s11   ;;  %s572_s10 = sphi %s608_s10, %s742_s10   ;;  %s568_s9 = sphi %s606_s9, %s741_s9  }
   0x7   : > { %s31_s17 = sadd.s32 1, %s584_s13  ;;  %s40_s18 = sadd.s32 1, %s576_s11 }
   0x8   : > { %p33_p0 = scmp.ge.s32.totalorder %s31_s17, 2  ;;  %p47_p1 = scmp.ne.s32.totalorder %s576_s11, %s572_s10 }
   0x9   : > { %p48_p2 = scmp.eq.s32.totalorder %s588_s14, 0  ;;  %p53_p3 = scmp.ne.s32.totalorder %s572_s10, %s568_s9 }
   0xa   : > { %s747_s17 = smov (%p33_p0, %s31_s17), 0  ;;  %p54_p5 = scmp.eq.s32.totalorder %s397_s15, 0 }
   0xb   : > { %p647_p4 = por %p48_p2, %p47_p1  ;;  %s35_s20 = ssub.s32 %s584_s13, %s747_s17 }
   0xc   : > { %p77_p6 = scmp.eq.s32.totalorder %s397_s15, 1  ;;  %p38_p7 = scmp.eq.s32.totalorder %s35_s20, 0 }
   0xd   : > { %p653_p8 = por %p54_p5, %p53_p3  ;;  %p83_p10 = scmp.eq.s32.totalorder %s398_s16, 1 }
   0xe   : > { %p657_p9 = por %p77_p6, %p47_p1  ;;  %p400_p12 = scmp.ge.s32.totalorder %s588_s14, 2 }
   0xf   : > { %s662_s23 = scalar_select %p38_p7, %s576_s11, %s40_s18  }
  0x10   : > { %p664_p11 = por %p83_p10, %p53_p3  ;;  %p425_p13 = scmp.lt.s32.totalorder %s588_s14, 2 }
  0x11   : > { %s129_s25 = sand.u32 1, %s576_s11   ;;  %s412_s27 = sshll.u32 %s584_s13, 3 }
  0x12   : > { %s401_s26 = sshll.u32 %s129_s25, 3  ;;  %s140_s30 = scalar_lea.hbm %s734_s0, %s412_s27 }
  0x13   : > { %s133_s3 = scalar_lea.vmem [#allocation2], %s401_s26  ;;  %s142_s5 = sshll.u32 %s140_s30, 4  ;;  %s143_s5 = int_to_ptr.hbm [resolvable:$true] %s142_s5 }
  0x14   : > { %s144_s4 = sshll.u32 %s133_s3, 4  ;;  %p418_p0 = pnand %p425_p13, %p647_p4  ;;  %s145_s4 = int_to_ptr.vmem [resolvable:$true] %s144_s4 }
  0x15   : > { %p404_p1 = scmp.ge.s32.totalorder %s588_s14, 1  ;;  %p149_p2 = scmp.lt.s32.totalorder %s588_s14, 3 }
  0x16   : > { %s130_s6 = scalar_lea.sflag [#allocation3], %s129_s25 }
  0x17   : > { %420 = dma.hbm_to_vmem [thread:$0]  (!%p418_p0), %s143_s5, 128, %s145_s4, %s130_s6  }
  0x18   : > { %p150_p3 = pnand %p404_p1, %p149_p2 }
  0x19   : > { %s680_s7 = sand.u32 (!%p150_p3), 1, %s572_s10  }
  0x1a   : > { %153 = sbr.rel (%p150_p3) target bundleno = 185 (0xb9), region = 24  ;;  %s405_s8 = sshll.u32 (!%p150_p3), %s680_s7, 3 }
  0x1b   : > { %s156_s15 = scalar_lea.sflag (!%p150_p3), [#allocation3], %s680_s7  ;;  %s159_s16 = scalar_lea.vmem (!%p150_p3), [#allocation2], %s405_s8 }
  0x1f   : > { %559 = dma.done.wait (%p653_p8), %s156_s15, 128  }
  0x20   : > { %561 = vsyncadd (%p653_p8), %s156_s15, 4294967168  ;;  %v198_v0 = vld [vmem:[%s159_s16] sm:$0xff]  ;;  %vm260_vm0 = vcmask 1043456   ;;  %p186_p4 = scmp.lt.s32.totalorder %s580_s12, 1  ;;  %s406_s19 = sshll.u32 %s680_s7, 2  ;;  %vm194_vm1 = vcmask 27648  }
  0x21   : > { %201 = vst [vmem:[#allocation1] ss:$2 sm:$0xff] %v198_v0  ;;  %s178_s27 = scalar_lea.vmem [#allocation5], %s406_s19  ;;  %v590_v10 = vmov 0.0   ;;  %vm196_vm2 = vcmask 3072   ;;  %s409_s28 = sshll.u32 %s580_s12, 2 }
  0x22   : > { %s187_s18 = scalar_select %p186_p4, %s580_s12, 1  ;;  %195 = vst.msk [vmem:[%s178_s27] sm:$0xf] %vm194_vm1, %v590_v10 }
  0x23   : > { %s284_s3 = scalar_lea.hbm %s735_s1, %s409_s28  ;;  %s286_s4 = sshll.u32 %s178_s27, 4  ;;  %s287_s4 = int_to_ptr.vmem [resolvable:$true] %s286_s4 }
  0x24   : > { %s407_s20 = sshll.u32 %s187_s18, 2  ;;  %s288_s5 = sshll.u32 %s284_s3, 4  ;;  %s289_s5 = int_to_ptr.hbm [resolvable:$true] %s288_s5 }
  0x25   : > { %s189_s26 = scalar_lea.vmem %s736_s2, %s407_s20  ;;  %s270_s12 = scalar_lea.sflag [#allocation4], %s680_s7 }
  0x26   : > { %197 = vst.msk [vmem:[%s189_s26] sm:$0xf] %vm196_vm2, %v590_v10  ;;  %s520_s6 = sshra.s32 %s289_s5, 4  ;;  %s526_s18 = scalar_lea.hbm %s735_s1, 8  ;;  %s521_s6 = int_to_ptr.hbm [resolvable:$true] %s520_s6 }
  0x27   : > { %s522_s8 = scalar_lea.hbm %s521_s6, 4  ;;  %p527_p8 = scmp.lt.s32.totalorder %s521_s6, %s735_s1 }
  0x28   : > { %v202_v1 = vld.sshfl [vmem:[#allocation1] sm:$0xff pattern:$0x75316420]  ;;  %v203_v2 = vld.sshfl [vmem:[#allocation1 + $0x8] sm:$0xff pattern:$0x75316420]  ;;  %p523_p5 = scmp.ne.s32.totalorder %s521_s6, %s522_s8  ;;  %p528_p10 = scmp.lt.s32.totalorder %s526_s18, %s522_s8 }
  0x29   : > { %206 = vst [vmem:[#allocation1] ss:$2 sm:$0xff] %v198_v0  ;;  %v199_v15 = vld [vmem:[%s178_s27] sm:$0xf] }
  0x2a   : > { %p524_p6 = pnand %p523_p5, %p657_p9  ;;  %p529_p13 = por %p528_p10, %p527_p8 }
  0x2c   : > { %p525_p7 = pneg %p524_p6 }
  0x2d   : > { %v254_v11 = vld [vmem:[%s189_s26] sm:$0xf] }
  0x2e   : > { %p530_p0 = pnand %p529_p13, %p525_p7 }
  0x30   : > { %v207_v3 = vld.sshfl [vmem:[#allocation1] sm:$0xff pattern:$0x75316420]  ;;  %v208_v4 = vld.sshfl [vmem:[#allocation1 + $0x8] sm:$0xff pattern:$0x75316420] }
  0x31   : > { %226 = vmatpush.xpose.msra.mxu0 %v207_v3  ;;  %246 = vmatpush.xpose.msra.mxu1 %v208_v4  ;;  %255 = vst [vmem:[#allocation1] ss:$2 sm:$0xff] %v198_v0 }
  0x34   : > { %227 = vmatmul.f32.vlgmr.msra.gmra.mxu0 %v202_v1  ;;  %247 = vmatmul.f32.vlgmr.msra.gmra.mxu1 %v203_v2 }
  0x38   : > { %v256_v5 = vld.sshfl [vmem:[#allocation1] sm:$0xff pattern:$0x75316420]  ;;  %v257_v6 = vld.sshfl [vmem:[#allocation1 + $0x8] sm:$0xff pattern:$0x75316420] }
  0x39   : > { %v261_v7 = vsel %vm260_vm0, %v256_v5, 0.0  ;;  %v262_v8 = vsel %vm260_vm0, %v257_v6, 0.0 }
  0x3a   : > { %v263_v9 = vadd.f32 %v262_v8, %v261_v7 }
  0x3c   : > { %264 = vadd.xlane.f32.xlu0 %v263_v9 }
  0xaf   : > { %v265_v12 = vpop.xlane.xlu0 %264 }
  0xb0   : > { %v266_v13 = vadd.f32 %v265_v12, %v254_v11 }
  0xb1   : > { %v228_v14 = vpop.f32.mrf.mxu0  ;;  %v248_v16 = vpop.f32.mrf.mxu1 }
  0xb2   : > { %v249_v17 = vadd.f32 %v248_v16, %v228_v14  ;;  %268 = vst.msk [vmem:[%s189_s26] sm:$0xf] %vm196_vm2, %v266_v13 }
  0xb4   : > { %v251_v18 = vadd.f32 %v249_v17, %v199_v15 }
  0xb6   : > { %253 = vst.msk [vmem:[%s178_s27] sm:$0xf] %vm194_vm1, %v251_v18 }
  0xb7   : > { %533 = shalt.err (!%p530_p0)
}
  0xb8   : > { %415 = dma.vmem_to_hbm [thread:$0]  (%p657_p9), %s287_s4, 64, %s289_s5, %s270_s12  }
  0xb9 PF: > { %s303_s7 = sand.u32 1, %s568_s9   ;;  %p422_p1 = pnand %p400_p12, %p664_p11 }
  0xba   : > { %s304_s21 = scalar_lea.sflag [#allocation4], %s303_s7 }
  0xbb   : > { %p423_p2 = pneg %p422_p1 }
  0xbd   : > { %563 = dma.done.wait (%p423_p2), %s304_s21, 64  }
  0xbe   : > { %565 = vsyncadd (%p423_p2), %s304_s21, 4294967232  ;;  %s19_s14 = sadd.s32 1, %s588_s14   ;;  %s741_s9 = smov %s572_s10 }
  0xbf   : > { %p16_p3 = scmp.ge.s32.totalorder %s19_s14, 4   ;;  %s742_s10 = smov %s576_s11 }
  0xc0   : > { %s743_s11 = smov %s662_s23  ;;  %s744_s12 = smov %s584_s13 }
  0xc1   : > { %s745_s13 = smov %s747_s17  ;;  %18 = sbr.rel (!%p16_p3) target bundleno = 6 (0x6), region = 85 }
  0xc6   :  { %317 = vsyncpa [#allocation3], 1 }
  0xc7   :  { %319 = vsyncpa [#allocation3 + $0x1], 1 }
  0xc8   :  { %320 = vsyncpa [#allocation4], 1 }
  0xc9   :  { %322 = vsyncpa [#allocation4 + $0x1], 1 }

</bundles_post_ra>
